<compile_context>
chip_gen: v7x
topology: tpu7x:2x2x1
jax: 0.10.0
libtpu: 0.0.40
codegen_flags: <defaults>
</compile_context>

<pallas_src>
import functools

import jax
import jax.numpy as jnp
import numpy as np
from jax.experimental import pallas as pl
from jax.experimental.pallas import tpu as pltpu


_VMEM_LIMIT = 32 * 1024 * 1024    # scoped VMEM requested from Mosaic (safe on v5e/v6e/v7x)
_VMEM_BUDGET = 20 * 1024 * 1024   # what we let the double-buffered blocks consume


def _round_up(x, m):
    return ((x + m - 1) // m) * m


def _pick_channel_tile(num_channels, per_channel_block_bytes, resident_bytes):
    """Largest divisor of num_channels whose double-buffered footprint fits."""
    avail = _VMEM_BUDGET - 2 * resident_bytes
    cap = avail // max(1, 2 * per_channel_block_bytes)
    cap = int(max(1, min(num_channels, cap)))
    for d in range(cap, 0, -1):
        if num_channels % d == 0:
            return d
    return 1


def _compute_dtype(dtype):
    # bf16 one-hot matmul is exact for bf16 data; everything else goes through
    # f32 (NOTE: lossy for integer data with |x| > 2^24 — this layer is used on
    # float activations in the reference model).
    return jnp.bfloat16 if dtype == jnp.bfloat16 else jnp.float32


# ----------------------------- squeeze2d -----------------------------------
def _squeeze_kernel(x_ref, sw_ref, o_ref, *, factor, W, Wf, ch_tile):
    """Space-to-depth for a block of `ch_tile` channels.

    x_ref : (1, CH, Hf, f*W)  input planes, rows pre-grouped by row-offset fh
                               (column range [fh*W,(fh+1)*W) holds rows h≡fh mod f)
    sw_ref: (W, W)            one-hot lane de-interleave matrix (compute dtype)
    o_ref : (1, CH, f, f, Hf, Wf) output block
    """
    f = factor
    sw = sw_ref[...]
    cdt = sw.dtype
    odt = o_ref.dtype

    def one_channel(cl):
        for fh in range(f):
            # Contiguous lane slice == the rows h = hf*f + fh of the plane.
            band = x_ref[0, cl, :, fh * W:(fh + 1) * W].astype(cdt)       # (Hf, W)
            # Lane de-interleave on the MXU: t[:, fw*Wf + wf] = band[:, wf*f + fw].
            t = jax.lax.dot_general(band, sw, (((1,), (0,)), ((), ())),
                                    preferred_element_type=jnp.float32)    # (Hf, W)
            t = t.astype(odt)
            for fw in range(f):
                o_ref[0, cl, fh, fw, :, :] = t[:, fw * Wf:(fw + 1) * Wf]

    if ch_tile <= 16:                       # small tiles: unroll for the scheduler
        for cl in range(ch_tile):
            one_channel(cl)
    else:                                   # large tiles: bounded code size
        @pl.loop(0, ch_tile)
        def _(cl):
            one_channel(cl)


def squeeze2d_pallas(x, factor):
    if factor == 1:
        return x
    B, C, H, W = x.shape
    f = int(factor)
    assert H % f == 0 and W % f == 0, "H or W modulo factor is not 0"
    Hf, Wf = H // f, W // f

    cdt = _compute_dtype(x.dtype)
    isz = np.dtype(x.dtype).itemsize
    csz = np.dtype(cdt).itemsize

    # One-hot lane de-interleave matrix: sw[w, fw*Wf + wf] = 1 iff w == wf*f + fw.
    cols = jnp.arange(W)
    src = (cols % Wf) * f + cols // Wf
    sw = (jnp.arange(W)[:, None] == src[None, :]).astype(cdt)             # (W, W)

    # VMEM-budgeted channel tile (double-buffered in + out blocks + resident sw).
    in_pc = _round_up(Hf, 8) * _round_up(f * W, 128) * isz
    out_pc = f * f * _round_up(Hf, 8) * _round_up(Wf, 128) * isz
    sw_bytes = _round_up(W, 8) * _round_up(W, 128) * csz
    ch_tile = _pick_channel_tile(C, in_pc + out_pc, sw_bytes)

    # Free reshape: (B,C,H,W) -> (B,C,Hf,f*W); row h = hf*f + fh maps to
    # element (hf, fh*W + w), so the row de-interleave becomes a lane slice.
    x4 = x.reshape(B, C, Hf, f * W)

    flops = 2 * B * C * H * W * W                     # lane-shuffle one-hot matmuls
    bytes_accessed = 2 * B * C * H * W * isz + W * W * csz

    kernel = functools.partial(_squeeze_kernel, factor=f, W=W, Wf=Wf,
                               ch_tile=ch_tile)
    out6 = pl.pallas_call(
        kernel,
        out_shape=jax.ShapeDtypeStruct((B, C, f, f, Hf, Wf), x.dtype),
        grid=(B, C // ch_tile),
        in_specs=[
            pl.BlockSpec((1, ch_tile, Hf, f * W), lambda b, c: (b, c, 0, 0)),
            # Constant index_map -> fetched once, not re-DMA'd per grid step.
            pl.BlockSpec((W, W), lambda b, c: (0, 0)),
        ],
        out_specs=pl.BlockSpec((1, ch_tile, f, f, Hf, Wf),
                               lambda b, c: (b, c, 0, 0, 0, 0)),
        compiler_params=pltpu.CompilerParams(
            dimension_semantics=("parallel", "parallel"),
            vmem_limit_bytes=_VMEM_LIMIT),
        cost_estimate=pl.CostEstimate(flops=flops, transcendentals=0,
                                      bytes_accessed=bytes_accessed),
    )(x4, sw)
    # Free, contiguous reshape: out channel = c*f*f + fh*f + fw.
    return out6.reshape(B, C * f * f, Hf, Wf)


# ---------------------------- unsqueeze2d -----------------------------------
def _unsqueeze_kernel(x_ref, rw_ref, o_ref, *, factor, W, co_tile):
    """Depth-to-space for a block of `co_tile` output channels.

    x_ref : (1, COt*f*f, H, W)  the f*f input planes per output channel
    rw_ref: (f, W, f*W)         one-hot lane interleave matrices (compute dtype)
    o_ref : (1, COt, H, f*f*W)  output; column range [a*f*W,(a+1)*f*W) holds
                                output rows ho = h*f + a
    """
    f = factor
    f2 = f * f
    Wout = f * W
    cdt = rw_ref.dtype
    odt = o_ref.dtype

    def one_channel(cl):
        for a in range(f):
            acc = None
            for b in range(f):
                plane = x_ref[0, cl * f2 + a * f + b].astype(cdt)          # (H, W)
                rw_b = rw_ref[b]                                           # (W, Wout)
                term = jax.lax.dot_general(plane, rw_b, (((1,), (0,)), ((), ())),
                                           preferred_element_type=jnp.float32)
                acc = term if acc is None else acc + term                  # (H, Wout)
            # Contiguous lane-slice store == output rows ho = h*f + a.
            o_ref[0, cl, :, a * Wout:(a + 1) * Wout] = acc.astype(odt)

    if co_tile <= 16:
        for cl in range(co_tile):
            one_channel(cl)
    else:
        @pl.loop(0, co_tile)
        def _(cl):
            one_channel(cl)


def unsqueeze2d_pallas(x, factor):
    if factor == 1:
        return x
    B, C, H, W = x.shape
    f = int(factor)
    f2 = f * f
    assert C % f2 == 0, "C module factor squared is not 0"
    Co = C // f2
    Wout = f * W

    cdt = _compute_dtype(x.dtype)
    isz = np.dtype(x.dtype).itemsize
    csz = np.dtype(cdt).itemsize

    # One-hot lane interleave matrices: rw[b, w, w*f + b] = 1.
    wo = jnp.arange(Wout)
    ww = jnp.arange(W)
    bb = jnp.arange(f)
    rw = (wo[None, None, :] ==
          (ww[None, :, None] * f + bb[:, None, None])).astype(cdt)         # (f, W, Wout)

    in_pc = f2 * _round_up(H, 8) * _round_up(W, 128) * isz
    out_pc = _round_up(H, 8) * _round_up(f2 * W, 128) * isz
    rw_bytes = f * _round_up(W, 8) * _round_up(Wout, 128) * csz
    co_tile = _pick_channel_tile(Co, in_pc + out_pc, rw_bytes)

    flops = 2 * B * C * f * H * W * W
    bytes_accessed = 2 * B * C * H * W * isz + f * W * Wout * csz

    kernel = functools.partial(_unsqueeze_kernel, factor=f, W=W, co_tile=co_tile)
    out4 = pl.pallas_call(
        kernel,
        out_shape=jax.ShapeDtypeStruct((B, Co, H, f2 * W), x.dtype),
        grid=(B, Co // co_tile),
        in_specs=[
            pl.BlockSpec((1, co_tile * f2, H, W), lambda b, g: (b, g, 0, 0)),
            pl.BlockSpec((f, W, Wout), lambda b, g: (0, 0, 0)),
        ],
        out_specs=pl.BlockSpec((1, co_tile, H, f2 * W), lambda b, g: (b, g, 0, 0)),
        compiler_params=pltpu.CompilerParams(
            dimension_semantics=("parallel", "parallel"),
            vmem_limit_bytes=_VMEM_LIMIT),
        cost_estimate=pl.CostEstimate(flops=flops, transcendentals=0,
                                      bytes_accessed=bytes_accessed),
    )(x, rw)
    # Free, contiguous reshape: element (b, co, h, a*f*W + wo) == (b, co, h*f+a, wo).
    return out4.reshape(B, Co, f * H, f * W)


# ------------------------- module-level forward ------------------------------
def squeeze_layer_forward(x, factor, logdet=None, reverse=False):
    """Mirrors SqueezeLayer.forward: `logdet` is accepted but (exactly as in
    the reference module) does not affect the returned output."""
    del logdet  # unused, matches the PyTorch module
    if reverse:
        return unsqueeze2d_pallas(x, factor)
    return squeeze2d_pallas(x, factor)


# ---------------- pure-JAX references for the correctness check --------------
def _ref_squeeze2d(x, f):
    if f == 1:
        return x
    B, C, H, W = x.shape
    y = x.reshape(B, C, H // f, f, W // f, f)
    y = jnp.transpose(y, (0, 1, 3, 5, 2, 4))
    return y.reshape(B, C * f * f, H // f, W // f)


def _ref_unsqueeze2d(x, f):
    if f == 1:
        return x
    B, C, H, W = x.shape
    y = x.reshape(B, C // (f * f), f, f, H, W)
    y = jnp.transpose(y, (0, 1, 4, 2, 5, 3))
    return y.reshape(B, C // (f * f), H * f, W * f)


if __name__ == "__main__":
    key = jax.random.PRNGKey(0)
    batch, channels, spatial, factor = 2, 4, 16, 2
    x = jax.random.normal(key, (batch, channels, spatial, spatial), jnp.float32)

    # forward (squeeze2d)
    y = jax.block_until_ready(squeeze_layer_forward(x, factor))
    y_ref = jax.block_until_ready(_ref_squeeze2d(x, factor))
    np.testing.assert_allclose(np.asarray(y), np.asarray(y_ref),
                               rtol=1e-6, atol=1e-6)
    assert y.shape == (batch, channels * factor * factor,
                       spatial // factor, spatial // factor)

    # reverse (unsqueeze2d) + round trip
    z = jax.block_until_ready(squeeze_layer_forward(y, factor, reverse=True))
    z_ref = jax.block_until_ready(_ref_unsqueeze2d(y, factor))
    np.testing.assert_allclose(np.asarray(z), np.asarray(z_ref),
                               rtol=1e-6, atol=1e-6)
    np.testing.assert_allclose(np.asarray(z), np.asarray(x),
                               rtol=1e-6, atol=1e-6)

    print("KERNEL_OK")
</pallas_src>

<mosaic_0001>
module attributes {stable_mosaic.version = 11 : i64} {
  func.func @_squeeze_kernel(%arg0: i32, %arg1: i32, %arg2: memref<1x4x8x32xf32, #tpu.memory_space<vmem>>, %arg3: memref<16x16xf32, #tpu.memory_space<vmem>>, %arg4: memref<1x4x2x2x8x8xf32, #tpu.memory_space<vmem>>) attributes {dimension_semantics = [#tpu.dimension_semantics<parallel>, #tpu.dimension_semantics<parallel>], iteration_bounds = array<i64: 2, 1>, scalar_prefetch = 0 : i64, scratch_operands = 0 : i64, tpu.core_type = #tpu.core_type<tc>, window_params = [{transform_indices = @transform_0, window_bounds = array<i64: 1, 4, 8, 32>}, {pipeline_mode = #tpu.pipeline_mode<synchronous>, transform_indices = @transform_1, window_bounds = array<i64: 16, 16>}, {transform_indices = @transform_2, window_bounds = array<i64: 1, 4, 2, 2, 8, 8>}]} {
    %c0 = arith.constant 0 : index
    %c0_0 = arith.constant 0 : index
    %0 = vector.load %arg3[%c0, %c0_0] : memref<16x16xf32, #tpu.memory_space<vmem>>, vector<16x16xf32>
    %c0_1 = arith.constant 0 : index
    %c0_2 = arith.constant 0 : index
    %c0_3 = arith.constant 0 : index
    %c0_4 = arith.constant 0 : index
    %1 = vector.load %arg2[%c0_1, %c0_2, %c0_3, %c0_4] : memref<1x4x8x32xf32, #tpu.memory_space<vmem>>, vector<1x1x8x16xf32>
    %2 = vector.shape_cast %1 : vector<1x1x8x16xf32> to vector<8x16xf32>
    %cst = arith.constant dense<0.000000e+00> : vector<8x16xf32>
    %3 = tpu.matmul %2, %0, %cst {dimension_numbers = #tpu.dot_dimension_numbers<[1], [0], [0], [1], [0, 0, 1, 1], [], []>} : vector<8x16xf32>, vector<16x16xf32>, vector<8x16xf32> -> vector<8x16xf32>
    %4 = vector.extract_strided_slice %3 {offsets = [0, 0], sizes = [8, 8], strides = [1, 1]} : vector<8x16xf32> to vector<8x8xf32>
    %c0_5 = arith.constant 0 : index
    %c0_6 = arith.constant 0 : index
    %c0_7 = arith.constant 0 : index
    %c0_8 = arith.constant 0 : index
    %c0_9 = arith.constant 0 : index
    %c0_10 = arith.constant 0 : index
    %5 = vector.load %arg4[%c0_5, %c0_6, %c0_7, %c0_8, %c0_9, %c0_10] : memref<1x4x2x2x8x8xf32, #tpu.memory_space<vmem>>, vector<1x1x1x1x8x8xf32>
    %6 = vector.shape_cast %5 : vector<1x1x1x1x8x8xf32> to vector<8x8xf32>
    %7 = vector.shape_cast %4 : vector<8x8xf32> to vector<1x1x1x1x8x8xf32>
    tpu.vector_store %arg4[%c0_5, %c0_6, %c0_7, %c0_8, %c0_9, %c0_10], %7 {strides = array<i32>} : memref<1x4x2x2x8x8xf32, #tpu.memory_space<vmem>>, vector<1x1x1x1x8x8xf32>,
    %8 = vector.extract_strided_slice %3 {offsets = [0, 8], sizes = [8, 8], strides = [1, 1]} : vector<8x16xf32> to vector<8x8xf32>
    %c0_11 = arith.constant 0 : index
    %c0_12 = arith.constant 0 : index
    %c0_13 = arith.constant 0 : index
    %c1 = arith.constant 1 : index
    %c0_14 = arith.constant 0 : index
    %c0_15 = arith.constant 0 : index
    %9 = vector.load %arg4[%c0_11, %c0_12, %c0_13, %c1, %c0_14, %c0_15] : memref<1x4x2x2x8x8xf32, #tpu.memory_space<vmem>>, vector<1x1x1x1x8x8xf32>
    %10 = vector.shape_cast %9 : vector<1x1x1x1x8x8xf32> to vector<8x8xf32>
    %11 = vector.shape_cast %8 : vector<8x8xf32> to vector<1x1x1x1x8x8xf32>
    tpu.vector_store %arg4[%c0_11, %c0_12, %c0_13, %c1, %c0_14, %c0_15], %11 {strides = array<i32>} : memref<1x4x2x2x8x8xf32, #tpu.memory_space<vmem>>, vector<1x1x1x1x8x8xf32>,
    %c0_16 = arith.constant 0 : index
    %c0_17 = arith.constant 0 : index
    %c0_18 = arith.constant 0 : index
    %c16 = arith.constant 16 : index
    %12 = vector.load %arg2[%c0_16, %c0_17, %c0_18, %c16] : memref<1x4x8x32xf32, #tpu.memory_space<vmem>>, vector<1x1x8x16xf32>
    %13 = vector.shape_cast %12 : vector<1x1x8x16xf32> to vector<8x16xf32>
    %cst_19 = arith.constant dense<0.000000e+00> : vector<8x16xf32>
    %14 = tpu.matmul %13, %0, %cst_19 {dimension_numbers = #tpu.dot_dimension_numbers<[1], [0], [0], [1], [0, 0, 1, 1], [], []>} : vector<8x16xf32>, vector<16x16xf32>, vector<8x16xf32> -> vector<8x16xf32>
    %15 = vector.extract_strided_slice %14 {offsets = [0, 0], sizes = [8, 8], strides = [1, 1]} : vector<8x16xf32> to vector<8x8xf32>
    %c0_20 = arith.constant 0 : index
    %c0_21 = arith.constant 0 : index
    %c1_22 = arith.constant 1 : index
    %c0_23 = arith.constant 0 : index
    %c0_24 = arith.constant 0 : index
    %c0_25 = arith.constant 0 : index
    %16 = vector.load %arg4[%c0_20, %c0_21, %c1_22, %c0_23, %c0_24, %c0_25] : memref<1x4x2x2x8x8xf32, #tpu.memory_space<vmem>>, vector<1x1x1x1x8x8xf32>
    %17 = vector.shape_cast %16 : vector<1x1x1x1x8x8xf32> to vector<8x8xf32>
    %18 = vector.shape_cast %15 : vector<8x8xf32> to vector<1x1x1x1x8x8xf32>
    tpu.vector_store %arg4[%c0_20, %c0_21, %c1_22, %c0_23, %c0_24, %c0_25], %18 {strides = array<i32>} : memref<1x4x2x2x8x8xf32, #tpu.memory_space<vmem>>, vector<1x1x1x1x8x8xf32>,
    %19 = vector.extract_strided_slice %14 {offsets = [0, 8], sizes = [8, 8], strides = [1, 1]} : vector<8x16xf32> to vector<8x8xf32>
    %c0_26 = arith.constant 0 : index
    %c0_27 = arith.constant 0 : index
    %c1_28 = arith.constant 1 : index
    %c1_29 = arith.constant 1 : index
    %c0_30 = arith.constant 0 : index
    %c0_31 = arith.constant 0 : index
    %20 = vector.load %arg4[%c0_26, %c0_27, %c1_28, %c1_29, %c0_30, %c0_31] : memref<1x4x2x2x8x8xf32, #tpu.memory_space<vmem>>, vector<1x1x1x1x8x8xf32>
    %21 = vector.shape_cast %20 : vector<1x1x1x1x8x8xf32> to vector<8x8xf32>
    %22 = vector.shape_cast %19 : vector<8x8xf32> to vector<1x1x1x1x8x8xf32>
    tpu.vector_store %arg4[%c0_26, %c0_27, %c1_28, %c1_29, %c0_30, %c0_31], %22 {strides = array<i32>} : memref<1x4x2x2x8x8xf32, #tpu.memory_space<vmem>>, vector<1x1x1x1x8x8xf32>,
    %c0_32 = arith.constant 0 : index
    %c1_33 = arith.constant 1 : index
    %c0_34 = arith.constant 0 : index
    %c0_35 = arith.constant 0 : index
    %23 = vector.load %arg2[%c0_32, %c1_33, %c0_34, %c0_35] : memref<1x4x8x32xf32, #tpu.memory_space<vmem>>, vector<1x1x8x16xf32>
    %24 = vector.shape_cast %23 : vector<1x1x8x16xf32> to vector<8x16xf32>
    %cst_36 = arith.constant dense<0.000000e+00> : vector<8x16xf32>
    %25 = tpu.matmul %24, %0, %cst_36 {dimension_numbers = #tpu.dot_dimension_numbers<[1], [0], [0], [1], [0, 0, 1, 1], [], []>} : vector<8x16xf32>, vector<16x16xf32>, vector<8x16xf32> -> vector<8x16xf32>
    %26 = vector.extract_strided_slice %25 {offsets = [0, 0], sizes = [8, 8], strides = [1, 1]} : vector<8x16xf32> to vector<8x8xf32>
    %c0_37 = arith.constant 0 : index
    %c1_38 = arith.constant 1 : index
    %c0_39 = arith.constant 0 : index
    %c0_40 = arith.constant 0 : index
    %c0_41 = arith.constant 0 : index
    %c0_42 = arith.constant 0 : index
    %27 = vector.load %arg4[%c0_37, %c1_38, %c0_39, %c0_40, %c0_41, %c0_42] : memref<1x4x2x2x8x8xf32, #tpu.memory_space<vmem>>, vector<1x1x1x1x8x8xf32>
    %28 = vector.shape_cast %27 : vector<1x1x1x1x8x8xf32> to vector<8x8xf32>
    %29 = vector.shape_cast %26 : vector<8x8xf32> to vector<1x1x1x1x8x8xf32>
    tpu.vector_store %arg4[%c0_37, %c1_38, %c0_39, %c0_40, %c0_41, %c0_42], %29 {strides = array<i32>} : memref<1x4x2x2x8x8xf32, #tpu.memory_space<vmem>>, vector<1x1x1x1x8x8xf32>,
    %30 = vector.extract_strided_slice %25 {offsets = [0, 8], sizes = [8, 8], strides = [1, 1]} : vector<8x16xf32> to vector<8x8xf32>
    %c0_43 = arith.constant 0 : index
    %c1_44 = arith.constant 1 : index
    %c0_45 = arith.constant 0 : index
    %c1_46 = arith.constant 1 : index
    %c0_47 = arith.constant 0 : index
    %c0_48 = arith.constant 0 : index
    %31 = vector.load %arg4[%c0_43, %c1_44, %c0_45, %c1_46, %c0_47, %c0_48] : memref<1x4x2x2x8x8xf32, #tpu.memory_space<vmem>>, vector<1x1x1x1x8x8xf32>
    %32 = vector.shape_cast %31 : vector<1x1x1x1x8x8xf32> to vector<8x8xf32>
    %33 = vector.shape_cast %30 : vector<8x8xf32> to vector<1x1x1x1x8x8xf32>
    tpu.vector_store %arg4[%c0_43, %c1_44, %c0_45, %c1_46, %c0_47, %c0_48], %33 {strides = array<i32>} : memref<1x4x2x2x8x8xf32, #tpu.memory_space<vmem>>, vector<1x1x1x1x8x8xf32>,
    %c0_49 = arith.constant 0 : index
    %c1_50 = arith.constant 1 : index
    %c0_51 = arith.constant 0 : index
    %c16_52 = arith.constant 16 : index
    %34 = vector.load %arg2[%c0_49, %c1_50, %c0_51, %c16_52] : memref<1x4x8x32xf32, #tpu.memory_space<vmem>>, vector<1x1x8x16xf32>
    %35 = vector.shape_cast %34 : vector<1x1x8x16xf32> to vector<8x16xf32>
    %cst_53 = arith.constant dense<0.000000e+00> : vector<8x16xf32>
    %36 = tpu.matmul %35, %0, %cst_53 {dimension_numbers = #tpu.dot_dimension_numbers<[1], [0], [0], [1], [0, 0, 1, 1], [], []>} : vector<8x16xf32>, vector<16x16xf32>, vector<8x16xf32> -> vector<8x16xf32>
    %37 = vector.extract_strided_slice %36 {offsets = [0, 0], sizes = [8, 8], strides = [1, 1]} : vector<8x16xf32> to vector<8x8xf32>
    %c0_54 = arith.constant 0 : index
    %c1_55 = arith.constant 1 : index
    %c1_56 = arith.constant 1 : index
    %c0_57 = arith.constant 0 : index
    %c0_58 = arith.constant 0 : index
    %c0_59 = arith.constant 0 : index
    %38 = vector.load %arg4[%c0_54, %c1_55, %c1_56, %c0_57, %c0_58, %c0_59] : memref<1x4x2x2x8x8xf32, #tpu.memory_space<vmem>>, vector<1x1x1x1x8x8xf32>
    %39 = vector.shape_cast %38 : vector<1x1x1x1x8x8xf32> to vector<8x8xf32>
    %40 = vector.shape_cast %37 : vector<8x8xf32> to vector<1x1x1x1x8x8xf32>
    tpu.vector_store %arg4[%c0_54, %c1_55, %c1_56, %c0_57, %c0_58, %c0_59], %40 {strides = array<i32>} : memref<1x4x2x2x8x8xf32, #tpu.memory_space<vmem>>, vector<1x1x1x1x8x8xf32>,
    %41 = vector.extract_strided_slice %36 {offsets = [0, 8], sizes = [8, 8], strides = [1, 1]} : vector<8x16xf32> to vector<8x8xf32>
    %c0_60 = arith.constant 0 : index
    %c1_61 = arith.constant 1 : index
    %c1_62 = arith.constant 1 : index
    %c1_63 = arith.constant 1 : index
    %c0_64 = arith.constant 0 : index
    %c0_65 = arith.constant 0 : index
    %42 = vector.load %arg4[%c0_60, %c1_61, %c1_62, %c1_63, %c0_64, %c0_65] : memref<1x4x2x2x8x8xf32, #tpu.memory_space<vmem>>, vector<1x1x1x1x8x8xf32>
    %43 = vector.shape_cast %42 : vector<1x1x1x1x8x8xf32> to vector<8x8xf32>
    %44 = vector.shape_cast %41 : vector<8x8xf32> to vector<1x1x1x1x8x8xf32>
    tpu.vector_store %arg4[%c0_60, %c1_61, %c1_62, %c1_63, %c0_64, %c0_65], %44 {strides = array<i32>} : memref<1x4x2x2x8x8xf32, #tpu.memory_space<vmem>>, vector<1x1x1x1x8x8xf32>,
    %c0_66 = arith.constant 0 : index
    %c2 = arith.constant 2 : index
    %c0_67 = arith.constant 0 : index
    %c0_68 = arith.constant 0 : index
    %45 = vector.load %arg2[%c0_66, %c2, %c0_67, %c0_68] : memref<1x4x8x32xf32, #tpu.memory_space<vmem>>, vector<1x1x8x16xf32>
    %46 = vector.shape_cast %45 : vector<1x1x8x16xf32> to vector<8x16xf32>
    %cst_69 = arith.constant dense<0.000000e+00> : vector<8x16xf32>
    %47 = tpu.matmul %46, %0, %cst_69 {dimension_numbers = #tpu.dot_dimension_numbers<[1], [0], [0], [1], [0, 0, 1, 1], [], []>} : vector<8x16xf32>, vector<16x16xf32>, vector<8x16xf32> -> vector<8x16xf32>
    %48 = vector.extract_strided_slice %47 {offsets = [0, 0], sizes = [8, 8], strides = [1, 1]} : vector<8x16xf32> to vector<8x8xf32>
    %c0_70 = arith.constant 0 : index
    %c2_71 = arith.constant 2 : index
    %c0_72 = arith.constant 0 : index
    %c0_73 = arith.constant 0 : index
    %c0_74 = arith.constant 0 : index
    %c0_75 = arith.constant 0 : index
    %49 = vector.load %arg4[%c0_70, %c2_71, %c0_72, %c0_73, %c0_74, %c0_75] : memref<1x4x2x2x8x8xf32, #tpu.memory_space<vmem>>, vector<1x1x1x1x8x8xf32>
    %50 = vector.shape_cast %49 : vector<1x1x1x1x8x8xf32> to vector<8x8xf32>
    %51 = vector.shape_cast %48 : vector<8x8xf32> to vector<1x1x1x1x8x8xf32>
    tpu.vector_store %arg4[%c0_70, %c2_71, %c0_72, %c0_73, %c0_74, %c0_75], %51 {strides = array<i32>} : memref<1x4x2x2x8x8xf32, #tpu.memory_space<vmem>>, vector<1x1x1x1x8x8xf32>,
    %52 = vector.extract_strided_slice %47 {offsets = [0, 8], sizes = [8, 8], strides = [1, 1]} : vector<8x16xf32> to vector<8x8xf32>
    %c0_76 = arith.constant 0 : index
    %c2_77 = arith.constant 2 : index
    %c0_78 = arith.constant 0 : index
    %c1_79 = arith.constant 1 : index
    %c0_80 = arith.constant 0 : index
    %c0_81 = arith.constant 0 : index
    %53 = vector.load %arg4[%c0_76, %c2_77, %c0_78, %c1_79, %c0_80, %c0_81] : memref<1x4x2x2x8x8xf32, #tpu.memory_space<vmem>>, vector<1x1x1x1x8x8xf32>
    %54 = vector.shape_cast %53 : vector<1x1x1x1x8x8xf32> to vector<8x8xf32>
    %55 = vector.shape_cast %52 : vector<8x8xf32> to vector<1x1x1x1x8x8xf32>
    tpu.vector_store %arg4[%c0_76, %c2_77, %c0_78, %c1_79, %c0_80, %c0_81], %55 {strides = array<i32>} : memref<1x4x2x2x8x8xf32, #tpu.memory_space<vmem>>, vector<1x1x1x1x8x8xf32>,
    %c0_82 = arith.constant 0 : index
    %c2_83 = arith.constant 2 : index
    %c0_84 = arith.constant 0 : index
    %c16_85 = arith.constant 16 : index
    %56 = vector.load %arg2[%c0_82, %c2_83, %c0_84, %c16_85] : memref<1x4x8x32xf32, #tpu.memory_space<vmem>>, vector<1x1x8x16xf32>
    %57 = vector.shape_cast %56 : vector<1x1x8x16xf32> to vector<8x16xf32>
    %cst_86 = arith.constant dense<0.000000e+00> : vector<8x16xf32>
    %58 = tpu.matmul %57, %0, %cst_86 {dimension_numbers = #tpu.dot_dimension_numbers<[1], [0], [0], [1], [0, 0, 1, 1], [], []>} : vector<8x16xf32>, vector<16x16xf32>, vector<8x16xf32> -> vector<8x16xf32>
    %59 = vector.extract_strided_slice %58 {offsets = [0, 0], sizes = [8, 8], strides = [1, 1]} : vector<8x16xf32> to vector<8x8xf32>
    %c0_87 = arith.constant 0 : index
    %c2_88 = arith.constant 2 : index
    %c1_89 = arith.constant 1 : index
    %c0_90 = arith.constant 0 : index
    %c0_91 = arith.constant 0 : index
    %c0_92 = arith.constant 0 : index
    %60 = vector.load %arg4[%c0_87, %c2_88, %c1_89, %c0_90, %c0_91, %c0_92] : memref<1x4x2x2x8x8xf32, #tpu.memory_space<vmem>>, vector<1x1x1x1x8x8xf32>
    %61 = vector.shape_cast %60 : vector<1x1x1x1x8x8xf32> to vector<8x8xf32>
    %62 = vector.shape_cast %59 : vector<8x8xf32> to vector<1x1x1x1x8x8xf32>
    tpu.vector_store %arg4[%c0_87, %c2_88, %c1_89, %c0_90, %c0_91, %c0_92], %62 {strides = array<i32>} : memref<1x4x2x2x8x8xf32, #tpu.memory_space<vmem>>, vector<1x1x1x1x8x8xf32>,
    %63 = vector.extract_strided_slice %58 {offsets = [0, 8], sizes = [8, 8], strides = [1, 1]} : vector<8x16xf32> to vector<8x8xf32>
    %c0_93 = arith.constant 0 : index
    %c2_94 = arith.constant 2 : index
    %c1_95 = arith.constant 1 : index
    %c1_96 = arith.constant 1 : index
    %c0_97 = arith.constant 0 : index
    %c0_98 = arith.constant 0 : index
    %64 = vector.load %arg4[%c0_93, %c2_94, %c1_95, %c1_96, %c0_97, %c0_98] : memref<1x4x2x2x8x8xf32, #tpu.memory_space<vmem>>, vector<1x1x1x1x8x8xf32>
    %65 = vector.shape_cast %64 : vector<1x1x1x1x8x8xf32> to vector<8x8xf32>
    %66 = vector.shape_cast %63 : vector<8x8xf32> to vector<1x1x1x1x8x8xf32>
    tpu.vector_store %arg4[%c0_93, %c2_94, %c1_95, %c1_96, %c0_97, %c0_98], %66 {strides = array<i32>} : memref<1x4x2x2x8x8xf32, #tpu.memory_space<vmem>>, vector<1x1x1x1x8x8xf32>,
    %c0_99 = arith.constant 0 : index
    %c3 = arith.constant 3 : index
    %c0_100 = arith.constant 0 : index
    %c0_101 = arith.constant 0 : index
    %67 = vector.load %arg2[%c0_99, %c3, %c0_100, %c0_101] : memref<1x4x8x32xf32, #tpu.memory_space<vmem>>, vector<1x1x8x16xf32>
    %68 = vector.shape_cast %67 : vector<1x1x8x16xf32> to vector<8x16xf32>
    %cst_102 = arith.constant dense<0.000000e+00> : vector<8x16xf32>
    %69 = tpu.matmul %68, %0, %cst_102 {dimension_numbers = #tpu.dot_dimension_numbers<[1], [0], [0], [1], [0, 0, 1, 1], [], []>} : vector<8x16xf32>, vector<16x16xf32>, vector<8x16xf32> -> vector<8x16xf32>
    %70 = vector.extract_strided_slice %69 {offsets = [0, 0], sizes = [8, 8], strides = [1, 1]} : vector<8x16xf32> to vector<8x8xf32>
    %c0_103 = arith.constant 0 : index
    %c3_104 = arith.constant 3 : index
    %c0_105 = arith.constant 0 : index
    %c0_106 = arith.constant 0 : index
    %c0_107 = arith.constant 0 : index
    %c0_108 = arith.constant 0 : index
    %71 = vector.load %arg4[%c0_103, %c3_104, %c0_105, %c0_106, %c0_107, %c0_108] : memref<1x4x2x2x8x8xf32, #tpu.memory_space<vmem>>, vector<1x1x1x1x8x8xf32>
    %72 = vector.shape_cast %71 : vector<1x1x1x1x8x8xf32> to vector<8x8xf32>
    %73 = vector.shape_cast %70 : vector<8x8xf32> to vector<1x1x1x1x8x8xf32>
    tpu.vector_store %arg4[%c0_103, %c3_104, %c0_105, %c0_106, %c0_107, %c0_108], %73 {strides = array<i32>} : memref<1x4x2x2x8x8xf32, #tpu.memory_space<vmem>>, vector<1x1x1x1x8x8xf32>,
    %74 = vector.extract_strided_slice %69 {offsets = [0, 8], sizes = [8, 8], strides = [1, 1]} : vector<8x16xf32> to vector<8x8xf32>
    %c0_109 = arith.constant 0 : index
    %c3_110 = arith.constant 3 : index
    %c0_111 = arith.constant 0 : index
    %c1_112 = arith.constant 1 : index
    %c0_113 = arith.constant 0 : index
    %c0_114 = arith.constant 0 : index
    %75 = vector.load %arg4[%c0_109, %c3_110, %c0_111, %c1_112, %c0_113, %c0_114] : memref<1x4x2x2x8x8xf32, #tpu.memory_space<vmem>>, vector<1x1x1x1x8x8xf32>
    %76 = vector.shape_cast %75 : vector<1x1x1x1x8x8xf32> to vector<8x8xf32>
    %77 = vector.shape_cast %74 : vector<8x8xf32> to vector<1x1x1x1x8x8xf32>
    tpu.vector_store %arg4[%c0_109, %c3_110, %c0_111, %c1_112, %c0_113, %c0_114], %77 {strides = array<i32>} : memref<1x4x2x2x8x8xf32, #tpu.memory_space<vmem>>, vector<1x1x1x1x8x8xf32>,
    %c0_115 = arith.constant 0 : index
    %c3_116 = arith.constant 3 : index
    %c0_117 = arith.constant 0 : index
    %c16_118 = arith.constant 16 : index
    %78 = vector.load %arg2[%c0_115, %c3_116, %c0_117, %c16_118] : memref<1x4x8x32xf32, #tpu.memory_space<vmem>>, vector<1x1x8x16xf32>
    %79 = vector.shape_cast %78 : vector<1x1x8x16xf32> to vector<8x16xf32>
    %cst_119 = arith.constant dense<0.000000e+00> : vector<8x16xf32>
    %80 = tpu.matmul %79, %0, %cst_119 {dimension_numbers = #tpu.dot_dimension_numbers<[1], [0], [0], [1], [0, 0, 1, 1], [], []>} : vector<8x16xf32>, vector<16x16xf32>, vector<8x16xf32> -> vector<8x16xf32>
    %81 = vector.extract_strided_slice %80 {offsets = [0, 0], sizes = [8, 8], strides = [1, 1]} : vector<8x16xf32> to vector<8x8xf32>
    %c0_120 = arith.constant 0 : index
    %c3_121 = arith.constant 3 : index
    %c1_122 = arith.constant 1 : index
    %c0_123 = arith.constant 0 : index
    %c0_124 = arith.constant 0 : index
    %c0_125 = arith.constant 0 : index
    %82 = vector.load %arg4[%c0_120, %c3_121, %c1_122, %c0_123, %c0_124, %c0_125] : memref<1x4x2x2x8x8xf32, #tpu.memory_space<vmem>>, vector<1x1x1x1x8x8xf32>
    %83 = vector.shape_cast %82 : vector<1x1x1x1x8x8xf32> to vector<8x8xf32>
    %84 = vector.shape_cast %81 : vector<8x8xf32> to vector<1x1x1x1x8x8xf32>
    tpu.vector_store %arg4[%c0_120, %c3_121, %c1_122, %c0_123, %c0_124, %c0_125], %84 {strides = array<i32>} : memref<1x4x2x2x8x8xf32, #tpu.memory_space<vmem>>, vector<1x1x1x1x8x8xf32>,
    %85 = vector.extract_strided_slice %80 {offsets = [0, 8], sizes = [8, 8], strides = [1, 1]} : vector<8x16xf32> to vector<8x8xf32>
    %c0_126 = arith.constant 0 : index
    %c3_127 = arith.constant 3 : index
    %c1_128 = arith.constant 1 : index
    %c1_129 = arith.constant 1 : index
    %c0_130 = arith.constant 0 : index
    %c0_131 = arith.constant 0 : index
    %86 = vector.load %arg4[%c0_126, %c3_127, %c1_128, %c1_129, %c0_130, %c0_131] : memref<1x4x2x2x8x8xf32, #tpu.memory_space<vmem>>, vector<1x1x1x1x8x8xf32>
    %87 = vector.shape_cast %86 : vector<1x1x1x1x8x8xf32> to vector<8x8xf32>
    %88 = vector.shape_cast %85 : vector<8x8xf32> to vector<1x1x1x1x8x8xf32>
    tpu.vector_store %arg4[%c0_126, %c3_127, %c1_128, %c1_129, %c0_130, %c0_131], %88 {strides = array<i32>} : memref<1x4x2x2x8x8xf32, #tpu.memory_space<vmem>>, vector<1x1x1x1x8x8xf32>,
    return
  }
  func.func @transform_0(%arg0: i32, %arg1: i32) -> (i32, i32, i32, i32) {
    %c0_i32 = arith.constant 0 : i32
    %c0_i32_0 = arith.constant 0 : i32
    %c0_i32_1 = arith.constant 0 : i32
    return %arg0, %arg1, %c0_i32, %c0_i32_0 : i32, i32, i32, i32
  }
  func.func @transform_1(%arg0: i32, %arg1: i32) -> (i32, i32) {
    %c0_i32 = arith.constant 0 : i32
    %c0_i32_0 = arith.constant 0 : i32
    %c0_i32_1 = arith.constant 0 : i32
    return %c0_i32, %c0_i32_0 : i32, i32
  }
  func.func @transform_2(%arg0: i32, %arg1: i32) -> (i32, i32, i32, i32, i32, i32) {
    %c0_i32 = arith.constant 0 : i32
    %c0_i32_0 = arith.constant 0 : i32
    %c0_i32_1 = arith.constant 0 : i32
    %c0_i32_2 = arith.constant 0 : i32
    %c0_i32_3 = arith.constant 0 : i32
    return %arg0, %arg1, %c0_i32, %c0_i32_0, %c0_i32_1, %c0_i32_2 : i32, i32, i32, i32, i32, i32
  }
}

</mosaic_0001>

<bundles_post_ra>
// kernel: tpu_custom_call.1
= control target key start
LH: loop header
LB: loop body
LE: loop exit
PB: predicated region body
PF: predicated region fallthrough
CT: control target
= control target key end

     0   :  { %7 = vsyncpa [#allocation3], 0  ;;  %s1673_s0 = inlined_call_operand.hbm [shape: f32[2,4,8,32], index: 0, kind: input, shape index: {}]   ;;  %s1674_s1 = inlined_call_operand.hbm [shape: f32[16,16], index: 1, kind: input, shape index: {}]   ;;  %s1675_s2 = inlined_call_operand.hbm [shape: f32[2,4,2,2,8,8], index: 2, kind: output, shape index: {}]  }
   0x1   :  { %9 = vsyncpa [#allocation3 + $0x1], 0 }
   0x2   :  { %10 = vsyncpa [#allocation6], 0 }
   0x3   :  { %11 = vsyncpa [#allocation4], 0 }
   0x4   :  { %13 = vsyncpa [#allocation4 + $0x1], 0  ;;  %s1388_s9 = smov 0   ;;  %s1390_s10 = smov 0  }
   0x5   :  { %s1392_s11 = smov 0   ;;  %s1394_s12 = smov 0  }
   0x6   :  { %s1396_s13 = smov 0   ;;  %s1398_s14 = smov 0  }
   0x7 LB: > { %s981_s15 = sadd.s32 4294967295, %s1359_s14   ;;  %s982_s16 = sadd.s32 4294967294, %s1359_s14   ;;  %s1359_s14 = sphi %s1398_s14, %s19_s14   ;;  %s1355_s13 = sphi %s1396_s13, %s1699_s13   ;;  %s1351_s12 = sphi %s1394_s12, %s1698_s12   ;;  %s1347_s11 = sphi %s1392_s11, %s1697_s11   ;;  %s1343_s10 = sphi %s1390_s10, %s1696_s10   ;;  %s1339_s9 = sphi %s1388_s9, %s1695_s9  }
   0x8   : > { %p53_p0 = scmp.ne.s32.totalorder %s1343_s10, %s1339_s9  ;;  %p1422_p1 = scmp.eq.s32.totalorder %s981_s15, 0 }
   0x9   : > { %p1426_p2 = scmp.eq.s32.totalorder %s981_s15, 1  ;;  %p106_p3 = scmp.eq.s32.totalorder %s982_s16, 1 }
   0xa   : > { %s1680_s17 = scalar_select %p1422_p1, 1, 0 }
   0xb   : > { %s1681_s18 = scalar_select %p1426_p2, 1, 0 }
   0xc   : > { %p1432_p4 = por %p1422_p1, %p53_p0  ;;  %p983_p5 = scmp.ge.s32.totalorder %s1359_s14, 1 }
   0xd   : > { %p1437_p6 = por %p106_p3, %p53_p0  ;;  %p113_p7 = scmp.lt.s32.totalorder %s1359_s14, 3 }
   0xe   : > { %s1682_s19 = scalar_select %p1432_p4, 1, 0 }
   0xf   : > { %s1683_s20 = scalar_select %p1437_p6, 1, 0 }
  0x10   : > { %p1442_p8 = pnand %p983_p5, %p113_p7  ;;  %s1361_s22 = smov [#allocation5]  }
  0x11   : > { %s125_s23 = sshll.u32 %s1361_s22, 4  ;;  %s31_s25 = sadd.s32 1, %s1355_s13  ;;  %s126_s23 = int_to_ptr.vmem [resolvable:$true] %s125_s23 }
  0x12   : > { %s1684_s21 = scalar_select %p1442_p8, 1, 0 }
  0x13   : > { %p1141_p9 = pneg %p1442_p8  ;;  %s1215_s28 = scalar_lea.hbm %s1674_s1, 256 }
  0x14   : > { %p1216_p12 = scmp.ne.s32.totalorder %s1674_s1, %s1215_s28  ;;  %p1222_p5 = scmp.lt.u32.totalorder %s1215_s28, %s1674_s1 }
  0x15   : > { %p1451_p11 = pnand %p1141_p9, %p1422_p1 }
  0x17   : > { %p1217_p13 = pneg %p1451_p11 }
  0x19   : > { %p1218_p0 = pnand %p1217_p13, %p1216_p12 }
  0x1b   : > { %p1219_p3 = pneg %p1218_p0 }
  0x1d   : > { %p1224_p7 = pnand %p1222_p5, %p1219_p3 }
  0x1f   : > { %1227 = shalt.err (!%p1224_p7)
}
  0x20   : > { %s1228_s5 = scalar_lea.vmem %s126_s23, 256  ;;  %p1236_p1 = scmp.lt.s32.totalorder %s126_s23, %s126_s23 }
  0x21   : > { %p1229_p9 = scmp.ne.s32.totalorder %s126_s23, %s1228_s5  ;;  %p1237_p4 = scmp.lt.s32.totalorder %s1228_s5, %s1228_s5 }
  0x23   : > { %p1231_p10 = pnand %p1229_p9, %p1217_p13  ;;  %p1238_p8 = por %p1237_p4, %p1236_p1 }
  0x25   : > { %p1232_p6 = pneg %p1231_p10 }
  0x27   : > { %p1239_p2 = pnand %p1238_p8, %p1232_p6 }
  0x29   : > { %1242 = shalt.err (!%p1239_p2)
}
  0x2a   : > { %s1362_s6 = smov 128   ;;  %s1363_s7 = smov 8  }
  0x2b   : > { %1144 = dma.hbm_to_vmem [thread:$0]  (!%p1451_p11), %s1674_s1, 256, %s126_s23, [#allocation6], %s1362_s6, %s1362_s6, %s1363_s7  }
  0x2c   : > { %p33_p1 = scmp.ge.s32.totalorder %s31_s25, 2  ;;  %s40_s16 = sadd.s32 1, %s1347_s11 }
  0x2d   : > { %p47_p2 = scmp.ne.s32.totalorder %s1347_s11, %s1343_s10  ;;  %p48_p4 = scmp.eq.s32.totalorder %s1359_s14, 0 }
  0x2e   : > { %s1701_s25 = smov (%p33_p1, %s31_s25), 0  ;;  %p1687_p8 = scmp.ne.s32.totalorder %s1681_s18, 0 }
  0x2f   : > { %p1481_p6 = por %p48_p4, %p47_p2  ;;  %s35_s26 = ssub.s32 %s1355_s13, %s1701_s25 }
  0x30   : > { %p1487_p10 = por %p1687_p8, %p47_p2  ;;  %p1154_p12 = scmp.lt.s32.totalorder %s1359_s14, 2 }
  0x31   : > { %p38_p11 = scmp.eq.s32.totalorder %s35_s26, 0  ;;  %s139_s23 = sand.u32 1, %s1347_s11  }
  0x32   : > { %s986_s27 = sshll.u32 %s139_s23, 5  ;;  %s1027_s29 = sshll.u32 %s1355_s13, 9 }
  0x33   : > { %s1496_s28 = scalar_select %p38_p11, %s1347_s11, %s40_s16  }
  0x34   : > { %s1502_s4 = scalar_lea.hbm %s1673_s0, %s1027_s29  ;;  %s143_s18 = scalar_lea.vmem [#allocation2], %s986_s27 }
  0x35   : > { %s152_s5 = sshll.u32 %s143_s18, 4  ;;  %p1508_p13 = pnand %p1154_p12, %p1481_p6  ;;  %s1504_s5 = int_to_ptr.vmem [resolvable:$true] %s152_s5 }
  0x36   : > { %s1512_s15 = scalar_lea.sflag [#allocation3], %s139_s23  ;;  %s1243_s16 = scalar_lea.hbm %s1502_s4, 512 }
  0x37   : > { %p1244_p0 = scmp.ne.s32.totalorder %s1502_s4, %s1243_s16  ;;  %p1245_p3 = pneg %p1508_p13 }
  0x38   : > { %s1248_s22 = scalar_lea.hbm %s1673_s0, 1024  ;;  %p1249_p9 = scmp.lt.u32.totalorder %s1502_s4, %s1673_s0 }
  0x39   : > { %p1246_p5 = pnand %p1245_p3, %p1244_p0  ;;  %p1250_p1 = scmp.lt.u32.totalorder %s1248_s22, %s1243_s16 }
  0x3a   : > { %p1252_p4 = scmp.lt.u32.totalorder %s1243_s16, %s1502_s4 }
  0x3b   : > { %p1247_p7 = pneg %p1246_p5  ;;  %p1251_p2 = por %p1250_p1, %p1249_p9 }
  0x3d   : > { %p1253_p6 = por %p1252_p4, %p1251_p2 }
  0x3f   : > { %p1254_p8 = pnand %p1253_p6, %p1247_p7 }
  0x41   : > { %1257 = shalt.err (!%p1254_p8)
}
  0x42   : > { %s1258_s23 = scalar_lea.vmem %s1504_s5, 512  ;;  %s1364_s3 = smov [#allocation2]  }
  0x43   : > { %p1259_p12 = scmp.ne.s32.totalorder %s1504_s5, %s1258_s23  ;;  %s1263_s18 = sshll.u32 %s1364_s3, 4  ;;  %s1264_s18 = int_to_ptr.vmem [resolvable:$false] %s1263_s18 }
  0x44   : > { %s1265_s26 = scalar_lea.vmem %s1264_s18, 1024  ;;  %p1266_p5 = scmp.lt.s32.totalorder %s1504_s5, %s1264_s18 }
  0x45   : > { %p1261_p11 = pnand %p1259_p12, %p1245_p3  ;;  %p1267_p9 = scmp.lt.s32.totalorder %s1265_s26, %s1258_s23 }
  0x47   : > { %p1262_p0 = pneg %p1261_p11  ;;  %p1268_p1 = por %p1267_p9, %p1266_p5 }
  0x49   : > { %p1269_p2 = pnand %p1268_p1, %p1262_p0 }
  0x4b   : > { %1272 = shalt.err (!%p1269_p2)
}
  0x4c   : > { %1148 = dma.hbm_to_vmem [thread:$0]  (!%p1508_p13), %s1502_s4, 512, %s1504_s5, %s1512_s15, %s1362_s6, %s1362_s6, %s1363_s7  }
  0x4d   : > { %p1690_p3 = scmp.ne.s32.totalorder %s1684_s21, 0 }
  0x4e   : > { %s1546_s16 = sand.u32 (!%p1690_p3), 1, %s1343_s10   ;;  %p1691_p7 = scmp.ne.s32.totalorder (!%p1690_p3), %s1682_s19, 0 }
  0x4f   : > { %164 = sbr.rel (%p1690_p3) target bundleno = 562 (0x232), region = 28  ;;  %s990_s27 = sshll.u32 (!%p1690_p3), %s1546_s16, 5 }
  0x50   : > { %s167_s22 = scalar_lea.sflag (!%p1690_p3), [#allocation3], %s1546_s16  ;;  %s170_s29 = scalar_lea.vmem (!%p1690_p3), [#allocation2], %s990_s27 }
  0x56   : > { %1326 = dma.done.wait (%p1691_p7), %s167_s22, 512  }
  0x57   : > { %1328 = vsyncadd (%p1691_p7), %s167_s22, 4294966784  ;;  %p1692_p4 = scmp.ne.s32.totalorder %s1680_s17, 0 }
  0x59   : > { %1330 = dma.done.wait (%p1692_p4), [#allocation6], 256  }
  0x5a   : > { %1332 = vsyncadd (%p1692_p4), [#allocation6], 4294967040  ;;  %v1365_v0 = vmov 0.0|0.0   ;;  %vm1366_vm0 = vmmov 0   ;;  %v1367_v1 = vmov 0.0   ;;  %v282_v2 = vld [vmem:[%s170_s29] sm:$0xff] }
  0x5b   : > { %1109 = vmatprep.subr.bf16.mxu0 %v1365_v0  ;;  %1112 = vmatprep.subr.bf16.mxu1 %v1365_v0  ;;  %v1010_v3 = vld [vmem:[%s170_s29 + $0x10] sm:$0xff]  ;;  %s1368_s21 = smov 112   ;;  %v197_v4 = vld [vmem:[#allocation5] sm:$0xff]  ;;  %v198_v5 = vld [vmem:[#allocation5 + $0x8] sm:$0xff]  ;;  %vm200_vm1 = vcmask 130048   ;;  %s992_s17 = sshll.u32 %s1546_s16, 7 }
  0x5c   : > { %1057 = vmatprep.mubr.msk.f32.mxu0 %vm1366_vm0, %v1367_v1  ;;  %1064 = vmatprep.mubr.msk.f32.mxu1 %vm1366_vm0, %v1367_v1  ;;  %v1002_v6 = vld [vmem:[%s170_s29 + $0x8] sm:$0xff]  ;;  %v1018_v7 = vld [vmem:[%s170_s29 + $0x18] sm:$0xff]  ;;  %v1110_v8 = vpack.c.bf16 %v198_v5, %v197_v4  ;;  %vm274_vm2 = vcmask 64512   ;;  %s1575_s19 = scalar_lea.vmem [#allocation7], %s992_s17  ;;  %s1369_s6 = smov 120  }
  0x5d   : > { %284 = vrot.lane.b32.xlu0 %v282_v2, %s1368_s21  ;;  %618 = vrot.lane.b32.xlu1 %v1010_v3, %s1368_s21  ;;  %s1028_s7 = sshll.u32 %s1351_s12, 11  ;;  %s884_s4 = sshll.u32 %s1575_s19, 4  ;;  %s1622_s4 = int_to_ptr.vmem [resolvable:$true] %s884_s4 }
  0x5e   : > { %1111 = vmatpush3.bf16.msra.mxu0 %v1110_v8  ;;  %1114 = vmatpush3.bf16.msra.mxu1 %v1110_v8  ;;  %s1620_s15 = scalar_lea.hbm %s1675_s2, %s1028_s7  ;;  %s868_s30 = scalar_lea.sflag [#allocation4], %s1546_s16 }
  0x5f   : > { %1115 = vmatprep.subr.bf16.mxu0 %v1365_v0  ;;  %1118 = vmatprep.subr.bf16.mxu1 %v1365_v0  ;;  %s1273_s23 = scalar_lea.vmem %s1622_s4, 2048  ;;  %s1370_s12 = smov [#allocation7]  }
  0x60   : > { %p1274_p13 = scmp.ne.s32.totalorder %s1622_s4, %s1273_s23  ;;  %s1277_s3 = sshll.u32 %s1370_s12, 4  ;;  %s1278_s3 = int_to_ptr.vmem [resolvable:$false] %s1277_s3 }
  0x61   : > { %451 = vrot.lane.b32.xlu0 %v1002_v6, %s1368_s21  ;;  %785 = vrot.lane.b32.xlu1 %v1018_v7, %s1368_s21  ;;  %s1279_s18 = scalar_lea.vmem %s1278_s3, 4096  ;;  %p1280_p12 = scmp.lt.s32.totalorder %s1622_s4, %s1278_s3 }
  0x62   : > { %1058 = vmatmul.mubr.msk.f32.vlgmr.msra.gmra.mrb[0].mxu0 %vm200_vm1, %v282_v2  ;;  %p1275_p6 = pnand %p1274_p13, %p1487_p10  ;;  %p1281_p11 = scmp.lt.s32.totalorder %s1279_s18, %s1273_s23 }
  0x63   : > { %1117 = vmatpush3.bf16.msra.mxu0 %v1110_v8  ;;  %1071 = vmatprep.mubr.msk.f32.mxu0 %vm1366_vm0, %v1367_v1 }
  0x64   : > { %1121 = vmatprep.subr.bf16.mxu0 %v1365_v0  ;;  %p1276_p8 = pneg %p1275_p6  ;;  %p1282_p0 = por %p1281_p11, %p1280_p12 }
  0x66   : > { %1072 = vmatmul.mubr.msk.f32.vlgmr.msra.gmra.mrb[2].mxu0 %vm200_vm1, %v1002_v6  ;;  %p1283_p5 = pnand %p1282_p0, %p1276_p8 }
  0x67   : > { %1123 = vmatpush3.bf16.msra.mxu0 %v1110_v8  ;;  %1085 = vmatprep.mubr.msk.f32.mxu0 %vm1366_vm0, %v1367_v1 }
  0x68   : > { %1127 = vmatprep.subr.bf16.mxu0 %v1365_v0 }
  0x6a   : > { %1086 = vmatmul.mubr.msk.f32.vlgmr.msra.gmra.mrb[4].mxu0 %vm200_vm1, %v1010_v3 }
  0x6b   : > { %1129 = vmatpush3.bf16.msra.mxu0 %v1110_v8  ;;  %1099 = vmatprep.mubr.msk.f32.mxu0 %vm1366_vm0, %v1367_v1 }
  0x6e   : > { %1100 = vmatmul.mubr.msk.f32.vlgmr.msra.gmra.mrb[6].mxu0 %vm200_vm1, %v1018_v7 }
  0xcf   : > { %v285_v9 = vpop.permute.xlu0 %284  ;;  %v619_v11 = vpop.permute.xlu1 %618 }
  0xd0   : > { %1065 = vmatmul.mubr.msk.f32.vlgmr.msra.gmra.mrb[0].mxu1 %vm200_vm1, %v285_v9 }
  0xd1   : > { %1120 = vmatpush3.bf16.msra.mxu1 %v1110_v8  ;;  %1078 = vmatprep.mubr.msk.f32.mxu1 %vm1366_vm0, %v1367_v1 }
  0xd2   : > { %1124 = vmatprep.subr.bf16.mxu1 %v1365_v0 }
  0xd3   : > { %v452_v10 = vpop.permute.xlu0 %451  ;;  %v786_v12 = vpop.permute.xlu1 %785 }
  0xd4   : > { %1079 = vmatmul.mubr.msk.f32.vlgmr.msra.gmra.mrb[2].mxu1 %vm200_vm1, %v452_v10 }
  0xd5   : > { %1126 = vmatpush3.bf16.msra.mxu1 %v1110_v8  ;;  %1092 = vmatprep.mubr.msk.f32.mxu1 %vm1366_vm0, %v1367_v1 }
  0xd6   : > { %1130 = vmatprep.subr.bf16.mxu1 %v1365_v0 }
  0xd8   : > { %1093 = vmatmul.mubr.msk.f32.vlgmr.msra.gmra.mrb[4].mxu1 %vm200_vm1, %v619_v11 }
  0xd9   : > { %1132 = vmatpush3.bf16.msra.mxu1 %v1110_v8  ;;  %1106 = vmatprep.mubr.msk.f32.mxu1 %vm1366_vm0, %v1367_v1 }
  0xdc   : > { %1107 = vmatmul.mubr.msk.f32.vlgmr.msra.gmra.mrb[6].mxu1 %vm200_vm1, %v786_v12 }
 0x135   : > { %v270_v13 = vpop.f32.mrb[0].mxu0 }
 0x136   : > { %275 = vst.msk [vmem:[%s1575_s19] sm:$0xff] %vm274_vm2, %v270_v13  ;;  %v1059_v14 = vpop.f32.mrb[1].mxu0  ;;  %277 = vrot.lane.b32.xlu0 %v270_v13, %s1369_s6 }
 0x139   : > { %v437_v15 = vpop.f32.mrb[2].mxu0 }
 0x13a   : > { %1000 = vst.msk [vmem:[%s1575_s19 + $0x20] sm:$0xff] %vm274_vm2, %v437_v15  ;;  %v1073_v16 = vpop.f32.mrb[3].mxu0  ;;  %444 = vrot.lane.b32.xlu0 %v437_v15, %s1369_s6 }
 0x13d   : > { %v604_v17 = vpop.f32.mrb[4].mxu0 }
 0x13e   : > { %1008 = vst.msk [vmem:[%s1575_s19 + $0x40] sm:$0xff] %vm274_vm2, %v604_v17  ;;  %v1087_v18 = vpop.f32.mrb[5].mxu0  ;;  %611 = vrot.lane.b32.xlu0 %v604_v17, %s1369_s6 }
 0x141   : > { %v771_v19 = vpop.f32.mrb[6].mxu0 }
 0x142   : > { %1016 = vst.msk [vmem:[%s1575_s19 + $0x60] sm:$0xff] %vm274_vm2, %v771_v19  ;;  %v1101_v20 = vpop.f32.mrb[7].mxu0  ;;  %778 = vrot.lane.b32.xlu0 %v771_v19, %s1369_s6 }
 0x1a3   : > { %v354_v21 = vpop.f32.mrb[0].mxu1 }
 0x1a4   : > { %996 = vst.msk [vmem:[%s1575_s19 + $0x10] sm:$0xff] %vm274_vm2, %v354_v21  ;;  %361 = vrot.lane.b32.xlu1 %v354_v21, %s1369_s6  ;;  %v1066_v22 = vpop.f32.mrb[1].mxu1 }
 0x1a7   : > { %v521_v23 = vpop.f32.mrb[2].mxu1 }
 0x1a8   : > { %1004 = vst.msk [vmem:[%s1575_s19 + $0x30] sm:$0xff] %vm274_vm2, %v521_v23  ;;  %528 = vrot.lane.b32.xlu1 %v521_v23, %s1369_s6  ;;  %v1080_v24 = vpop.f32.mrb[3].mxu1  ;;  %v278_v25 = vpop.permute.xlu0 %277 }
 0x1a9   : > { %994 = vst.msk [vmem:[%s1575_s19 + $0x8] sm:$0xff] %vm274_vm2, %v278_v25 }
 0x1ab   : > { %v688_v26 = vpop.f32.mrb[4].mxu1 }
 0x1ac   : > { %1012 = vst.msk [vmem:[%s1575_s19 + $0x50] sm:$0xff] %vm274_vm2, %v688_v26  ;;  %695 = vrot.lane.b32.xlu1 %v688_v26, %s1369_s6  ;;  %v1094_v27 = vpop.f32.mrb[5].mxu1  ;;  %v445_v28 = vpop.permute.xlu0 %444 }
 0x1ad   : > { %1001 = vst.msk [vmem:[%s1575_s19 + $0x28] sm:$0xff] %vm274_vm2, %v445_v28 }
 0x1af   : > { %v855_v29 = vpop.f32.mrb[6].mxu1 }
 0x1b0   : > { %1020 = vst.msk [vmem:[%s1575_s19 + $0x70] sm:$0xff] %vm274_vm2, %v855_v29  ;;  %862 = vrot.lane.b32.xlu1 %v855_v29, %s1369_s6  ;;  %v1108_v30 = vpop.f32.mrb[7].mxu1  ;;  %v612_v31 = vpop.permute.xlu0 %611 }
 0x1b1   : > { %1009 = vst.msk [vmem:[%s1575_s19 + $0x48] sm:$0xff] %vm274_vm2, %v612_v31 }
 0x1b4   : > { %v779_v32 = vpop.permute.xlu0 %778 }
 0x1b5   : > { %1017 = vst.msk [vmem:[%s1575_s19 + $0x68] sm:$0xff] %vm274_vm2, %v779_v32 }
 0x216   : > { %v362_v33 = vpop.permute.xlu1 %361 }
 0x217   : > { %997 = vst.msk [vmem:[%s1575_s19 + $0x18] sm:$0xff] %vm274_vm2, %v362_v33 }
 0x21a   : > { %v529_v34 = vpop.permute.xlu1 %528 }
 0x21b   : > { %1005 = vst.msk [vmem:[%s1575_s19 + $0x38] sm:$0xff] %vm274_vm2, %v529_v34 }
 0x21e   : > { %v696_v35 = vpop.permute.xlu1 %695 }
 0x21f   : > { %1013 = vst.msk [vmem:[%s1575_s19 + $0x58] sm:$0xff] %vm274_vm2, %v696_v35 }
 0x222   : > { %v863_v36 = vpop.permute.xlu1 %862 }
 0x223   : > { %1021 = vst.msk [vmem:[%s1575_s19 + $0x78] sm:$0xff] %vm274_vm2, %v863_v36 }
 0x224   : > { %1286 = shalt.err (!%p1283_p5)
}
 0x225   : > { %s1287_s26 = scalar_lea.hbm %s1620_s15, 2048  ;;  %s1291_s29 = scalar_lea.hbm %s1675_s2, 4096 }
 0x226   : > { %p1288_p9 = scmp.ne.s32.totalorder %s1620_s15, %s1287_s26  ;;  %p1292_p3 = scmp.lt.u32.totalorder %s1620_s15, %s1675_s2 }
 0x227   : > { %p1293_p7 = scmp.lt.u32.totalorder %s1291_s29, %s1287_s26  ;;  %p1295_p13 = scmp.lt.u32.totalorder %s1287_s26, %s1620_s15 }
 0x228   : > { %p1289_p1 = pnand %p1288_p9, %p1487_p10 }
 0x229   : > { %p1294_p4 = por %p1293_p7, %p1292_p3 }
 0x22a   : > { %p1290_p2 = pneg %p1289_p1 }
 0x22b   : > { %p1296_p6 = por %p1295_p13, %p1294_p4 }
 0x22d   : > { %p1297_p8 = pnand %p1296_p6, %p1290_p2 }
 0x22f   : > { %1300 = shalt.err (!%p1297_p8)
}
 0x230   : > { %s1371_s19 = smov 128   ;;  %s1372_s6 = smov 8  }
 0x231   : > { %1139 = dma.vmem_to_hbm [thread:$0]  (%p1487_p10), %s1622_s4, 2048, %s1620_s15, %s868_s30, %s1371_s19, %s1371_s19, %s1372_s6  }
 0x232 PF: > { %s899_s7 = sand.u32 1, %s1339_s9   ;;  %p1693_p12 = scmp.ne.s32.totalorder %s1683_s20, 0 }
 0x233   : > { %p1694_p11 = scmp.ge.s32.totalorder %s1359_s14, 2  ;;  %s900_s5 = scalar_lea.sflag [#allocation4], %s899_s7 }
 0x235   : > { %p1150_p0 = pnand %p1694_p11, %p1693_p12 }
 0x237   : > { %1334 = dma.done.wait (!%p1150_p0), %s900_s5, 2048  }
 0x238   : > { %1336 = vsyncadd (!%p1150_p0), %s900_s5, 4294965248  ;;  %s19_s14 = sadd.s32 1, %s1359_s14   ;;  %s1695_s9 = smov %s1343_s10 }
 0x239   : > { %p16_p5 = scmp.ge.s32.totalorder %s19_s14, 4   ;;  %s1696_s10 = smov %s1347_s11 }
 0x23a   : > { %s1697_s11 = smov %s1496_s28  ;;  %s1698_s12 = smov %s1355_s13 }
 0x23b   : > { %s1699_s13 = smov %s1701_s25  ;;  %18 = sbr.rel (!%p16_p5) target bundleno = 7 (0x7), region = 95 }
 0x242   :  { %905 = vsyncpa [#allocation3], 1 }
 0x243   :  { %907 = vsyncpa [#allocation3 + $0x1], 1 }
 0x244   :  { %908 = vsyncpa [#allocation6], 1 }
 0x245   :  { %909 = vsyncpa [#allocation4], 1 }
 0x246   :  { %911 = vsyncpa [#allocation4 + $0x1], 1 }

</bundles_post_ra>
